<compile_context>
chip_gen: v5e
topology: v5e:2x2
jax: 0.10.0
libtpu: 0.0.40
codegen_flags: <defaults>
</compile_context>

<pallas_src>
import functools
import math

import jax
import jax.numpy as jnp
from jax import lax
from jax.experimental import pallas as pl
from jax.experimental.pallas import tpu as pltpu


def _focal_sum_kernel(tgt_ref, x_ref, out_ref, *, gamma, smooth, eps,
                      num_valid_cols, tile_s, n_steps, n_tiles,
                      need_mask, first_masked_tile):
    """Accumulates sum_j (1-pt_j)^gamma * log(pt_j) into a (1,1,1,1) output block."""
    p = pl.program_id(1)
    s = pl.program_id(2)
    tile_idx = p * n_steps + s          # global spatial-tile index (may exceed n_tiles-1)

    @pl.when(s == 0)
    def _init():
        out_ref[...] = jnp.zeros_like(out_ref)

    x = x_ref[0].astype(jnp.float32)    # (C, TS) logits, classes on sublanes
    tgt = tgt_ref[0]                    # (1, TS) int32 class ids

    C, TS = x.shape
    cls_iota = lax.broadcasted_iota(jnp.int32, (C, TS), 0)
    key = (cls_iota == tgt).astype(jnp.float32)              # one-hot, (C, TS)
    if smooth is not None:                                    # matches reference init check
        key = jnp.clip(key, smooth, 1.0 - smooth)

    # softmax over the class axis without materializing full probs:
    #   pt = sum(key * softmax(x)) = sum(key * exp(x - mx)) / sum(exp(x - mx))
    mx = jnp.max(x, axis=0, keepdims=True)                    # (1, TS)
    ex = jnp.exp(x - mx)                                      # (C, TS)
    sum_ex = jnp.sum(ex, axis=0, keepdims=True)               # (1, TS)
    pt_num = jnp.sum(key * ex, axis=0, keepdims=True)         # (1, TS)
    # Exact divide kept (approx reciprocal would break the 1e-5 reference tolerance).
    pt = pt_num / sum_ex + eps
    logpt = jnp.log(pt)

    g = float(gamma)
    if g.is_integer():
        pow_term = lax.integer_pow(1.0 - pt, int(g))
    else:
        pow_term = jnp.power(1.0 - pt, g)
    focal = pow_term * logpt                                  # (1, TS)

    if need_mask:
        # Only tail / over tiles contain invalid columns; mask cost is gated to them.
        @pl.when(tile_idx < first_masked_tile)
        def _full_tile():
            out_ref[...] += jnp.sum(focal, keepdims=True)

        @pl.when(tile_idx >= first_masked_tile)
        def _tail_tile():
            col = tile_idx * tile_s + lax.broadcasted_iota(jnp.int32, (1, TS), 1)
            masked = jnp.where(col < num_valid_cols, focal, 0.0)
            out_ref[...] += jnp.sum(masked, keepdims=True)
    else:
        out_ref[...] += jnp.sum(focal, keepdims=True)


def _prepare_alpha(num_class, alpha, balance_index=-1):
    """Replicates the alpha preprocessing in MultiFocalLoss.__init__."""
    if alpha is None:
        return jnp.ones((num_class,), jnp.float32)
    if isinstance(alpha, float):
        a = jnp.full((num_class,), 1.0 - alpha, jnp.float32)
        return a.at[balance_index].set(alpha)
    a = jnp.asarray(alpha, jnp.float32).reshape(num_class)
    return a / jnp.sum(a)


def _vmem_capacity_bytes():
    """Per-core VMEM capacity; conservative 64 MiB (v7x) fallback if query fails."""
    try:
        info = pltpu.get_tpu_info()
        for attr in ("vmem_capacity_bytes", "vmem_bytes", "vmem_size_bytes"):
            v = getattr(info, attr, None)
            if v:
                return int(v)
    except Exception:
        pass
    return 64 * 1024 * 1024


def multi_focal_loss(x, target, alpha=None, gamma=2.0, smooth=None,
                     size_average=True, balance_index=-1, max_tile_s=None):
    """Forward pass of MultiFocalLoss. `x` is NCHW (or (N, C)); `target` holds ints."""
    if smooth is not None and (smooth < 0 or smooth > 1.0):
        raise ValueError('smooth value should be in [0,1]')

    num_class = x.shape[1]
    a_vec = _prepare_alpha(num_class, alpha, balance_index)

    if x.ndim > 2:
        B = x.shape[0]
        S = math.prod(x.shape[2:])
        x3 = x.reshape(B, num_class, S)           # free: contiguous view, no HBM copy
    else:
        # TODO(synk): the (N, C) path still pays one wrapper-side HBM transpose so the
        # class axis lands on sublanes; a per-tile in-kernel relayout would remove it.
        B = 1
        S = x.shape[0]
        x3 = jnp.transpose(x, (1, 0))[None]       # (1, C, N)

    tgt3 = target.reshape(B, 1, S).astype(jnp.int32)
    M = B * S

    # alpha factorizes out of the loss -> tiny gather outside the kernel.
    s_alpha = jnp.sum(a_vec[target.reshape(-1).astype(jnp.int32)])

    # --- budget-driven spatial (lane) tile + per-generation VMEM limit --------
    itemsize = jnp.dtype(x.dtype).itemsize
    vmem_cap = _vmem_capacity_bytes()                       # 128 MiB v5e/v6e, 64 MiB v7x
    vmem_limit = int(min((vmem_cap * 3) // 4, 96 * 1024 * 1024))   # leave headroom
    # double-buffered logits block + double-buffered int32 target block, per column
    per_col_pipeline_bytes = 2 * (num_class * itemsize + 4)
    tile_cap = (vmem_limit // 2) // per_col_pipeline_bytes  # use ~half the limit for blocks
    tile_cap = min(tile_cap, (8 * 1024 * 1024) // max(1, num_class * itemsize))  # <=8 MiB/block
    tile_cap = max(128, (tile_cap // 128) * 128)
    if max_tile_s is not None:                              # test/tuning override only
        tile_cap = min(tile_cap, max(128, (int(max_tile_s) // 128) * 128))
    tile_s = S if S <= tile_cap else tile_cap               # full extent needs no 128-pad

    n_tiles = pl.cdiv(S, tile_s)
    # Keep >=2 units of work on the parallel axes when batch == 1 (v7x has 2 TCs).
    n_par = 1 if B >= 2 else min(n_tiles, 4)
    n_steps = pl.cdiv(n_tiles, n_par)
    need_mask = (n_par * n_steps * tile_s) != S
    first_masked_tile = S // tile_s                         # first tile with invalid columns

    def spatial_map(b, p, s):
        # Clamp over-tiles to the last real tile (never DMA out of bounds);
        # the kernel fully masks their contribution.
        t = jnp.minimum(p * n_steps + s, n_tiles - 1)
        return (b, 0, t)

    kern = functools.partial(
        _focal_sum_kernel, gamma=float(gamma), smooth=smooth, eps=1e-10,
        num_valid_cols=S, tile_s=tile_s, n_steps=n_steps, n_tiles=n_tiles,
        need_mask=need_mask, first_masked_tile=first_masked_tile)

    partial_focal = pl.pallas_call(
        kern,
        out_shape=jax.ShapeDtypeStruct((B, n_par, 1, 1), jnp.float32),
        grid_spec=pltpu.PrefetchScalarGridSpec(
            num_scalar_prefetch=0,
            grid=(B, n_par, n_steps),
            in_specs=[
                pl.BlockSpec((1, 1, tile_s), spatial_map),           # target ids
                pl.BlockSpec((1, num_class, tile_s), spatial_map),   # logits (native dtype)
            ],
            out_specs=pl.BlockSpec((1, 1, 1, 1), lambda b, p, s: (b, p, 0, 0)),
        ),
        compiler_params=pltpu.CompilerParams(
            dimension_semantics=("parallel", "parallel", "arbitrary"),
            vmem_limit_bytes=vmem_limit),
    )(tgt3, x3)

    s_focal = jnp.sum(partial_focal)
    total = -(s_alpha * s_focal)             # sum over the (M,1,M) broadcast tensor
    if size_average:
        return total / jnp.float32(M * M)    # mean over the (M,1,M) broadcast tensor
    return total


def _reference_loss(x, target, alpha_vec=None, gamma=2.0, smooth=None, size_average=True):
    """Pure-JAX re-implementation of the exact PyTorch forward (for verification)."""
    num_class = x.shape[1]
    if alpha_vec is None:
        alpha_vec = jnp.ones((num_class,), jnp.float32)
    probs = jax.nn.softmax(x, axis=1)
    if x.ndim > 2:
        perm = (0,) + tuple(range(2, x.ndim)) + (1,)
        rows = jnp.transpose(probs, perm).reshape(-1, num_class)
    else:
        rows = probs.reshape(-1, num_class)
    tgt = target.reshape(-1).astype(jnp.int32)
    one_hot = jax.nn.one_hot(tgt, num_class, dtype=jnp.float32)
    if smooth is not None:
        one_hot = jnp.clip(one_hot, smooth, 1.0 - smooth)
    pt = jnp.sum(one_hot * rows, axis=1) + 1e-10
    logpt = jnp.log(pt)
    a = alpha_vec.reshape(-1)[tgt]                               # (M,)
    f = jnp.power(1.0 - pt, gamma) * logpt                       # (M,)
    full = -a[:, None, None] * f[None, None, :]                  # (M,1,M) like torch broadcast
    return jnp.mean(full) if size_average else jnp.sum(full)


if __name__ == "__main__":
    key = jax.random.PRNGKey(0)
    kx, kt, kx2, kt2, kx3, kt3 = jax.random.split(key, 6)

    # Case 1: NCHW, default options (typical dense-prediction use).
    N, C, H, W = 2, 4, 16, 16
    x = jax.random.normal(kx, (N, C, H, W), dtype=jnp.float32)
    target = jax.random.randint(kt, (N, H, W), 0, C, dtype=jnp.int32)
    loss = jax.block_until_ready(multi_focal_loss(x, target, gamma=2.0))
    ref = jax.block_until_ready(_reference_loss(x, target, gamma=2.0))
    assert jnp.allclose(loss, ref, rtol=1e-5, atol=1e-6), (loss, ref)

    # Case 2: batch=1 with forced small tiles -> exercises the partial-tail mask,
    # clamped over-tiles and the extra "parallel" spatial-chunk axis (no wrapper pad).
    x2 = jax.random.normal(kx2, (1, 4, 21, 30), dtype=jnp.float32)
    t2 = jax.random.randint(kt2, (1, 21, 30), 0, 4, dtype=jnp.int32)
    loss2 = jax.block_until_ready(multi_focal_loss(x2, t2, max_tile_s=128))
    ref2 = jax.block_until_ready(_reference_loss(x2, t2))
    assert jnp.allclose(loss2, ref2, rtol=1e-4, atol=1e-6), (loss2, ref2)

    # Case 3: (N, C) logits with list alpha, label smoothing and sum reduction.
    alpha = [1.0, 2.0, 3.0, 4.0]
    x3 = jax.random.normal(kx3, (8, 4), dtype=jnp.float32)
    t3 = jax.random.randint(kt3, (8,), 0, 4, dtype=jnp.int32)
    loss3 = jax.block_until_ready(
        multi_focal_loss(x3, t3, alpha=alpha, gamma=2.0, smooth=0.1, size_average=False))
    ref3 = jax.block_until_ready(
        _reference_loss(x3, t3, alpha_vec=_prepare_alpha(4, alpha),
                        gamma=2.0, smooth=0.1, size_average=False))
    assert jnp.allclose(loss3, ref3, rtol=1e-4, atol=1e-6), (loss3, ref3)

    print("KERNEL_OK")
</pallas_src>

<mosaic_0001>
module attributes {stable_mosaic.version = 11 : i64} {
  func.func @_focal_sum_kernel(%arg0: i32, %arg1: i32, %arg2: i32, %arg3: memref<1x1x256xi32, #tpu.memory_space<vmem>>, %arg4: memref<1x4x256xf32, #tpu.memory_space<vmem>>, %arg5: memref<1x1x1x1xf32, #tpu.memory_space<vmem>>) attributes {dimension_semantics = [#tpu.dimension_semantics<parallel>, #tpu.dimension_semantics<parallel>, #tpu.dimension_semantics<arbitrary>], iteration_bounds = array<i64: 2, 1, 1>, scalar_prefetch = 0 : i64, scratch_operands = 0 : i64, tpu.core_type = #tpu.core_type<tc>, window_params = [{transform_indices = @transform_0, window_bounds = array<i64: 1, 1, 256>}, {transform_indices = @transform_1, window_bounds = array<i64: 1, 4, 256>}, {transform_indices = @transform_2, window_bounds = array<i64: 1, 1, 1, 1>}]} {
    %c0_i32 = arith.constant 0 : i32
    %0 = arith.cmpi eq, %arg2, %c0_i32 : i32
    %1 = arith.extui %0 : i1 to i32
    %c0_i32_0 = arith.constant 0 : i32
    %2 = arith.cmpi ne, %1, %c0_i32_0 : i32
    scf.if %2 {
      %cst_19 = arith.constant 0.000000e+00 : f32
      %39 = vector.broadcast %cst_19 : f32 to vector<1x1x1x1xf32>
      %c0_20 = arith.constant 0 : index
      %c0_21 = arith.constant 0 : index
      %c0_22 = arith.constant 0 : index
      %c0_23 = arith.constant 0 : index
      %40 = vector.load %arg5[%c0_20, %c0_21, %c0_22, %c0_23] : memref<1x1x1x1xf32, #tpu.memory_space<vmem>>, vector<1x1x1x1xf32>
      tpu.vector_store %arg5[%c0_20, %c0_21, %c0_22, %c0_23], %39 {strides = array<i32>} : memref<1x1x1x1xf32, #tpu.memory_space<vmem>>, vector<1x1x1x1xf32>,
    } else {
    }
    %c0 = arith.constant 0 : index
    %c0_1 = arith.constant 0 : index
    %c0_2 = arith.constant 0 : index
    %3 = vector.load %arg4[%c0, %c0_1, %c0_2] : memref<1x4x256xf32, #tpu.memory_space<vmem>>, vector<1x4x256xf32>
    %4 = vector.shape_cast %3 : vector<1x4x256xf32> to vector<4x256xf32>
    %c0_3 = arith.constant 0 : index
    %c0_4 = arith.constant 0 : index
    %c0_5 = arith.constant 0 : index
    %5 = vector.load %arg3[%c0_3, %c0_4, %c0_5] : memref<1x1x256xi32, #tpu.memory_space<vmem>>, vector<1x1x256xi32>
    %6 = vector.shape_cast %5 : vector<1x1x256xi32> to vector<1x256xi32>
    %7 = tpu.iota {dimensions = array<i32: 0>} : vector<4x256xi32>
    %8 = vector.broadcast %6 : vector<1x256xi32> to vector<4x256xi32>
    %9 = arith.cmpi eq, %7, %8 : vector<4x256xi32>
    %10 = arith.extui %9 : vector<4x256xi1> to vector<4x256xi32>
    %11 = arith.sitofp %10 : vector<4x256xi32> to vector<4x256xf32>
    %cst = arith.constant dense<0xFF800000> : vector<256xf32>
    %12 = vector.multi_reduction <maximumf>, %4, %cst [0] : vector<4x256xf32> to vector<256xf32>
    %13 = vector.shape_cast %12 : vector<256xf32> to vector<1x256xf32>
    %14 = vector.broadcast %13 : vector<1x256xf32> to vector<4x256xf32>
    %15 = arith.subf %4, %14 : vector<4x256xf32>
    %16 = math.exp %15 : vector<4x256xf32>
    %cst_6 = arith.constant dense<0.000000e+00> : vector<256xf32>
    %17 = vector.multi_reduction <add>, %16, %cst_6 [0] : vector<4x256xf32> to vector<256xf32>
    %18 = vector.shape_cast %17 : vector<256xf32> to vector<1x256xf32>
    %19 = arith.mulf %11, %16 : vector<4x256xf32>
    %cst_7 = arith.constant dense<0.000000e+00> : vector<256xf32>
    %20 = vector.multi_reduction <add>, %19, %cst_7 [0] : vector<4x256xf32> to vector<256xf32>
    %21 = vector.shape_cast %20 : vector<256xf32> to vector<1x256xf32>
    %22 = arith.divf %21, %18 : vector<1x256xf32>
    %cst_8 = arith.constant 1.000000e-10 : f32
    %23 = vector.broadcast %cst_8 : f32 to vector<1x256xf32>
    %24 = arith.addf %22, %23 : vector<1x256xf32>
    %25 = math.log %24 : vector<1x256xf32>
    %cst_9 = arith.constant 1.000000e+00 : f32
    %26 = vector.broadcast %cst_9 : f32 to vector<1x256xf32>
    %27 = arith.subf %26, %24 : vector<1x256xf32>
    %28 = arith.mulf %27, %27 : vector<1x256xf32>
    %29 = arith.mulf %28, %25 : vector<1x256xf32>
    %c0_10 = arith.constant 0 : index
    %c0_11 = arith.constant 0 : index
    %c0_12 = arith.constant 0 : index
    %c0_13 = arith.constant 0 : index
    %30 = vector.load %arg5[%c0_10, %c0_11, %c0_12, %c0_13] : memref<1x1x1x1xf32, #tpu.memory_space<vmem>>, vector<1x1x1x1xf32>
    %31 = vector.shape_cast %29 : vector<1x256xf32> to vector<1x1x256xf32>
    %cst_14 = arith.constant dense<0.000000e+00> : vector<1xf32>
    %32 = vector.multi_reduction <add>, %31, %cst_14 [1, 2] : vector<1x1x256xf32> to vector<1xf32>
    %33 = vector.shape_cast %32 : vector<1xf32> to vector<1x1x1xf32>
    %34 = vector.extract %33[0, 0, 0] : f32 from vector<1x1x1xf32>
    %35 = vector.broadcast %34 : f32 to vector<1x1xf32>
    %36 = vector.shape_cast %35 : vector<1x1xf32> to vector<1x1x1x1xf32>
    %37 = arith.addf %30, %36 : vector<1x1x1x1xf32>
    %c0_15 = arith.constant 0 : index
    %c0_16 = arith.constant 0 : index
    %c0_17 = arith.constant 0 : index
    %c0_18 = arith.constant 0 : index
    %38 = vector.load %arg5[%c0_15, %c0_16, %c0_17, %c0_18] : memref<1x1x1x1xf32, #tpu.memory_space<vmem>>, vector<1x1x1x1xf32>
    tpu.vector_store %arg5[%c0_15, %c0_16, %c0_17, %c0_18], %37 {strides = array<i32>} : memref<1x1x1x1xf32, #tpu.memory_space<vmem>>, vector<1x1x1x1xf32>,
    return
  }
  func.func @transform_0(%arg0: i32, %arg1: i32, %arg2: i32) -> (i32, i32, i32) {
    %c1_i32 = arith.constant 1 : i32
    %0 = arith.muli %arg1, %c1_i32 : i32
    %1 = arith.addi %0, %arg2 : i32
    %c0_i32 = arith.constant 0 : i32
    %2 = arith.minsi %1, %c0_i32 : i32
    %c0_i32_0 = arith.constant 0 : i32
    %c0_i32_1 = arith.constant 0 : i32
    return %arg0, %c0_i32_0, %2 : i32, i32, i32
  }
  func.func @transform_1(%arg0: i32, %arg1: i32, %arg2: i32) -> (i32, i32, i32) {
    %c1_i32 = arith.constant 1 : i32
    %0 = arith.muli %arg1, %c1_i32 : i32
    %1 = arith.addi %0, %arg2 : i32
    %c0_i32 = arith.constant 0 : i32
    %2 = arith.minsi %1, %c0_i32 : i32
    %c0_i32_0 = arith.constant 0 : i32
    %c0_i32_1 = arith.constant 0 : i32
    return %arg0, %c0_i32_0, %2 : i32, i32, i32
  }
  func.func @transform_2(%arg0: i32, %arg1: i32, %arg2: i32) -> (i32, i32, i32, i32) {
    %c0_i32 = arith.constant 0 : i32
    %c0_i32_0 = arith.constant 0 : i32
    %c0_i32_1 = arith.constant 0 : i32
    return %arg0, %arg1, %c0_i32, %c0_i32_0 : i32, i32, i32, i32
  }
}

</mosaic_0001>

<bundles_post_ra>
// kernel: tpu_custom_call.1
= control target key start
LH: loop header
LB: loop body
LE: loop exit
PB: predicated region body
PF: predicated region fallthrough
CT: control target
= control target key end

     0   :  { %7 = vsyncpa [#allocation3], 0  ;;  %s856_s0 = inlined_call_operand.hbm [shape: s32[2,1,256], index: 0, kind: input, shape index: {}]   ;;  %s857_s1 = inlined_call_operand.hbm [shape: f32[2,4,256], index: 1, kind: input, shape index: {}]   ;;  %s858_s2 = inlined_call_operand.vmem [shape: f32[2,1,1,1], index: 2, kind: output, shape index: {}]  }
   0x1   :  { %9 = vsyncpa [#allocation3 + $0x1], 0 }
   0x2   :  { %10 = vsyncpa [#allocation5], 0 }
   0x3   :  { %12 = vsyncpa [#allocation5 + $0x1], 0  ;;  %s738_s9 = smov 0   ;;  %s740_s10 = smov 0  }
   0x4   :  { %s742_s11 = smov 0   ;;  %s744_s12 = smov 0  }
   0x5   :  { %s746_s13 = smov 0   ;;  %s748_s14 = smov 0  }
   0x6 LB: > { %s516_s15 = sadd.s32 4294967295, %s720_s14   ;;  %s37_s16 = sadd.s32 1, %s716_s13  ;;  %s720_s14 = sphi %s748_s14, %s18_s14   ;;  %s716_s13 = sphi %s746_s13, %s866_s13   ;;  %s712_s12 = sphi %s744_s12, %s865_s12   ;;  %s708_s11 = sphi %s742_s11, %s864_s11   ;;  %s704_s10 = sphi %s740_s10, %s863_s10   ;;  %s700_s9 = sphi %s738_s9, %s862_s9  }
   0x7   : > { %p39_p0 = scmp.ge.s32.totalorder %s37_s16, 2  ;;  %s52_s17 = sadd.s32 1, %s708_s11 }
   0x8   : > { %p59_p1 = scmp.ne.s32.totalorder %s708_s11, %s704_s10  ;;  %p60_p2 = scmp.eq.s32.totalorder %s720_s14, 0 }
   0x9   : > { %s868_s16 = smov (%p39_p0, %s37_s16), 0  ;;  %p65_p4 = scmp.ne.s32.totalorder %s704_s10, %s700_s9 }
   0xa   : > { %p774_p3 = por %p60_p2, %p59_p1  ;;  %s47_s19 = ssub.s32 %s716_s13, %s868_s16 }
   0xb   : > { %p66_p5 = scmp.eq.s32.totalorder %s516_s15, 0  ;;  %p50_p6 = scmp.eq.s32.totalorder %s47_s19, 0 }
   0xc   : > { %p546_p8 = scmp.lt.s32.totalorder %s720_s14, 2  ;;  %s151_s22 = sand.u32 1, %s708_s11  }
   0xd   : > { %p781_p7 = por %p66_p5, %p65_p4  ;;  %s521_s23 = sshll.u32 %s716_s13, 1 }
   0xe   : > { %s787_s21 = scalar_select %p50_p6, %s708_s11, %s52_s17  }
   0xf   : > { %s520_s24 = sshll.u32 %s151_s22, 1  ;;  %s164_s27 = scalar_lea.hbm %s856_s0, %s521_s23 }
  0x10   : > { %s166_s28 = sshll.u32 %s164_s27, 4  ;;  %s155_s29 = scalar_lea.vmem [#allocation2], %s520_s24  ;;  %s167_s28 = int_to_ptr.hbm [resolvable:$true] %s166_s28 }
  0x11   : > { %s168_s30 = sshll.u32 %s155_s29, 4  ;;  %p796_p9 = pnand %p546_p8, %p774_p3  ;;  %s169_s30 = int_to_ptr.vmem [resolvable:$true] %s168_s30 }
  0x12   : > { %p525_p10 = scmp.ge.s32.totalorder %s720_s14, 1  ;;  %p198_p11 = scmp.lt.s32.totalorder %s720_s14, 3 }
  0x13   : > { %s522_s4 = sshll.u32 %s151_s22, 3  ;;  %s152_s5 = scalar_lea.sflag [#allocation3], %s151_s22 }
  0x14   : > { %542 = dma.hbm_to_vmem [thread:$0]  (!%p796_p9), %s167_s28, 32, %s169_s30, %s152_s5  }
  0x15   : > { %p199_p12 = pnand %p525_p10, %p198_p11  ;;  %s532_s6 = sshll.u32 %s716_s13, 3 }
  0x16   : > { %s179_s7 = scalar_lea.vmem [#allocation4], %s522_s4  ;;  %s189_s17 = scalar_lea.hbm %s857_s1, %s532_s6 }
  0x17   : > { %s193_s8 = sshll.u32 %s179_s7, 4  ;;  %s191_s18 = sshll.u32 %s189_s17, 4  ;;  %s194_s8 = int_to_ptr.vmem [resolvable:$true] %s193_s8  ;;  %s192_s18 = int_to_ptr.hbm [resolvable:$true] %s191_s18 }
  0x18   : > { %s176_s19 = scalar_lea.sflag [#allocation5], %s151_s22  ;;  %202 = sbr.rel (%p199_p12) target bundleno = 308 (0x134), region = 28 }
  0x19   : > { %545 = dma.hbm_to_vmem [thread:$0]  (!%p796_p9), %s192_s18, 128, %s194_s8, %s176_s19  }
  0x1a   : > { %s204_s23 = sand.u32 (!%p199_p12), 1, %s704_s10  }
  0x1b   : > { %s526_s24 = sshll.u32 (!%p199_p12), %s204_s23, 1  ;;  %s205_s25 = scalar_lea.sflag (!%p199_p12), [#allocation3], %s204_s23 }
  0x1c   : > { %s811_s26 = scalar_lea.vmem (!%p199_p12), [#allocation2], %s526_s24 }
  0x1d   : > { %691 = dma.done.wait (%p781_p7), %s205_s25, 32  }
  0x1e   : > { %693 = vsyncadd (%p781_p7), %s205_s25, 4294967264  ;;  %s527_s27 = sshll.u32 %s204_s23, 3  ;;  %s215_s28 = scalar_lea.sflag [#allocation5], %s204_s23 }
  0x1f   : > { %s218_s29 = scalar_lea.vmem [#allocation4], %s527_s27 }
  0x20   : > { %695 = dma.done.wait (%p781_p7), %s215_s28, 128  }
  0x21   : > { %697 = vsyncadd (%p781_p7), %s215_s28, 4294967168  ;;  %v266_v0 = vld [vmem:[%s218_s29] sm:$0xff]  ;;  %vm284_vm0 = vcmask 1043456   ;;  %v268_v22 = vlaneseq  ;;  %v267_v23 = vld [vmem:[%s811_s26] sm:$0x3]  ;;  %v722_v35 = vmov 0.0  }
  0x22   : > { %279 = vst [vmem:[#allocation1] ss:$2 sm:$0xff] %v266_v0  ;;  %v270_v25 = vperm.slane %v267_v23, 0  ;;  %v271_v26 = vperm.slane %v267_v23, 1  ;;  %vm391_vm11 = vcmask 1040384   ;;  %p254_p13 = scmp.lt.s32.totalorder %s712_s12, 1 }
  0x23   : > { %v269_v24 = vshrl.u32 %v268_v22, 7  ;;  %vm264_vm12 = vcmask 0  }
  0x24   : > { %s870_s12 = smov (!%p254_p13, %s712_s12), 1 }
  0x25   : > { %vm272_vm1 = vcmp.eq.s32.totalorder %v269_v24, %v270_v25  ;;  %vm273_vm2 = vcmp.eq.s32.totalorder %v269_v24, %v271_v26  ;;  %s259_s30 = scalar_lea.vmem %s858_s2, %s870_s12 }
  0x26   : > { %v528_v36 = vsel %vm272_vm1, 1.0, %v722_v35  ;;  %v529_v37 = vsel %vm273_vm2, 1.0, %v722_v35  ;;  %265 = vst.msk [vmem:[%s259_s30] sm:$0x1] %vm264_vm12, %v722_v35 }
  0x29   : > { %v280_v1 = vld.sshfl [vmem:[#allocation1] sm:$0xff pattern:$0x75316420]  ;;  %v281_v2 = vld.sshfl [vmem:[#allocation1 + $0x8] sm:$0xff pattern:$0x75316420] }
  0x2a   : > { %v285_v3 = vsel %vm284_vm0, %v280_v1, -inf  ;;  %v292_v4 = vsel %vm284_vm0, %v281_v2, -inf }
  0x2b   : > { %v286_v5 = vrot.slane %v285_v3, 4  ;;  %v293_v6 = vrot.slane %v292_v4, 4 }
  0x2d   : > { %v287_v7 = vmax.f32 %v285_v3, %v286_v5  ;;  %v294_v8 = vmax.f32 %v292_v4, %v293_v6 }
  0x2f   : > { %v288_v9 = vrot.slane %v287_v7, 2  ;;  %v295_v10 = vrot.slane %v294_v8, 2 }
  0x31   : > { %v289_v11 = vmax.f32 %v287_v7, %v288_v9  ;;  %v296_v12 = vmax.f32 %v294_v8, %v295_v10 }
  0x33   : > { %v290_v13 = vrot.slane %v289_v11, 1  ;;  %v297_v14 = vrot.slane %v296_v12, 1 }
  0x35   : > { %v291_v15 = vmax.f32 %v289_v11, %v290_v13  ;;  %v298_v16 = vmax.f32 %v296_v12, %v297_v14 }
  0x37   : > { %v301_v17 = vrot.slane %v298_v16, 4 }
  0x39   : > { %v302_v18 = vsel %vm284_vm0, %v291_v15, %v301_v17 }
  0x3a   : > { %v304_v19 = vsub.f32 %v266_v0, %v302_v18 }
  0x3c   : > { %v305_v20 = vmul.f32 1.442695, %v304_v19 }
  0x3e   : > { %596 = vpow2.f32 %v305_v20 }
  0x44   : > { %v597_v21 = vpop.eup %596 }
  0x45   : > { %308 = vst [vmem:[#allocation1] ss:$2 sm:$0xff] %v597_v21 }
  0x4c   : > { %v309_v27 = vld.sshfl [vmem:[#allocation1] sm:$0xff pattern:$0x75316420]  ;;  %v310_v28 = vld.sshfl [vmem:[#allocation1 + $0x8] sm:$0xff pattern:$0x75316420] }
  0x4d   : > { %v313_v29 = vsel %vm284_vm0, %v309_v27, 0.0  ;;  %v320_v30 = vsel %vm284_vm0, %v310_v28, 0.0  ;;  %327 = vst [vmem:[#allocation1] ss:$2 sm:$0xff] %v597_v21 }
  0x4e   : > { %v314_v31 = vrot.slane %v313_v29, 4  ;;  %v321_v32 = vrot.slane %v320_v30, 4 }
  0x50   : > { %v315_v33 = vadd.f32 %v314_v31, %v313_v29  ;;  %v322_v34 = vadd.f32 %v321_v32, %v320_v30 }
  0x52   : > { %v316_v38 = vrot.slane %v315_v33, 2  ;;  %v323_v39 = vrot.slane %v322_v34, 2 }
  0x54   : > { %v317_v40 = vadd.f32 %v316_v38, %v315_v33  ;;  %v324_v41 = vadd.f32 %v323_v39, %v322_v34  ;;  %v328_v42 = vld.sshfl [vmem:[#allocation1] sm:$0xff pattern:$0x75316420]  ;;  %v329_v43 = vld.sshfl [vmem:[#allocation1 + $0x8] sm:$0xff pattern:$0x75316420] }
  0x55   : > { %v332_v44 = vmul.f32 %v528_v36, %v328_v42  ;;  %v333_v45 = vmul.f32 %v529_v37, %v329_v43 }
  0x56   : > { %v318_v46 = vrot.slane %v317_v40, 1  ;;  %v325_v47 = vrot.slane %v324_v41, 1 }
  0x57   : > { %v334_v48 = vsel %vm284_vm0, %v332_v44, 0.0  ;;  %v341_v49 = vsel %vm284_vm0, %v333_v45, 0.0  ;;  %v390_v45 = vld [vmem:[%s259_s30] sm:$0x1] }
  0x58   : > { %v319_v50 = vadd.f32 %v318_v46, %v317_v40  ;;  %v326_v51 = vadd.f32 %v325_v47, %v324_v41  ;;  %v335_v52 = vrot.slane %v334_v48, 4  ;;  %v342_v53 = vrot.slane %v341_v49, 4 }
  0x5a   : > { %v336_v54 = vadd.f32 %v335_v52, %v334_v48  ;;  %v343_v55 = vadd.f32 %v342_v53, %v341_v49  ;;  %598 = vrcp.f32 %v319_v50  ;;  %vm353_vm3 = vweird.f32 %v319_v50 }
  0x5b   : > { %600 = vrcp.f32 %v326_v51  ;;  %v357_v63 = vand.u32 2147483647, %v319_v50  ;;  %v359_v0 = vand.u32 2147483648, %v319_v50  ;;  %vm368_vm4 = vweird.f32 %v326_v51 }
  0x5c   : > { %v337_v56 = vrot.slane %v336_v54, 2  ;;  %v344_v57 = vrot.slane %v343_v55, 2  ;;  %v374_v4 = vand.u32 2147483648, %v326_v51  ;;  %v372_v7 = vand.u32 2147483647, %v326_v51 }
  0x5d   : > { %v360_v9 = vor.u32 1.1754944e-38, %v359_v0  ;;  %vm358_vm8 = vcmp.eq.f32.partialorder %v357_v63, 8.507059e+37 }
  0x5e   : > { %v338_v58 = vadd.f32 %v337_v56, %v336_v54  ;;  %v345_v60 = vadd.f32 %v344_v57, %v343_v55  ;;  %v375_v13 = vor.u32 1.1754944e-38, %v374_v4  ;;  %vm373_vm10 = vcmp.eq.f32.partialorder %v372_v7, 8.507059e+37 }
  0x60   : > { %v599_v59 = vpop.eup %598  ;;  %v339_v2 = vrot.slane %v338_v58, 1  ;;  %v346_v5 = vrot.slane %v345_v60, 1 }
  0x61   : > { %v601_v61 = vpop.eup %600  ;;  %v349_v62 = vmul.f32 %v599_v59, %v319_v50  ;;  %vm354_vm5 = vweird.f32 %v599_v59 }
  0x62   : > { %v364_v1 = vmul.f32 %v601_v61, %v326_v51  ;;  %vm369_vm6 = vweird.f32 %v601_v61  ;;  %vm355_vm7 = vmor %vm353_vm3, %vm354_vm5  ;;  %v340_v11 = vadd.f32 %v339_v2, %v338_v58  ;;  %v347_v14 = vadd.f32 %v346_v5, %v345_v60 }
  0x63   : > { %v350_v3 = vsub.f32 1.0, %v349_v62  ;;  %vm370_vm9 = vmor %vm368_vm4, %vm369_vm6 }
  0x64   : > { %v365_v6 = vsub.f32 1.0, %v364_v1 }
  0x65   : > { %v351_v8 = vmul.f32 %v599_v59, %v350_v3 }
  0x66   : > { %v366_v10 = vmul.f32 %v601_v61, %v365_v6 }
  0x67   : > { %v352_v12 = vadd.f32 %v599_v59, %v351_v8 }
  0x68   : > { %v367_v15 = vadd.f32 %v601_v61, %v366_v10 }
  0x69   : > { %v356_v16 = vsel %vm355_vm7, %v599_v59, %v352_v12 }
  0x6a   : > { %v361_v17 = vsel %vm358_vm8, %v360_v9, %v356_v16  ;;  %v371_v18 = vsel %vm370_vm9, %v601_v61, %v367_v15 }
  0x6b   : > { %v362_v19 = vmul.f32 %v361_v17, %v340_v11  ;;  %v376_v20 = vsel %vm373_vm10, %v375_v13, %v371_v18 }
  0x6c   : > { %v377_v21 = vmul.f32 %v376_v20, %v347_v14 }
  0x6d   : > { %v378_v22 = vadd.f32 1e-10, %v362_v19 }
  0x6e   : > { %v379_v23 = vadd.f32 1e-10, %v377_v21 }
  0x6f   : > { %602 = vlog2.f32 %v378_v22  ;;  %v384_v24 = vsub.f32 1.0, %v378_v22 }
  0x70   : > { %604 = vlog2.f32 %v379_v23  ;;  %v385_v25 = vsub.f32 1.0, %v379_v23 }
  0x71   : > { %v386_v26 = vmul.f32 %v384_v24, %v384_v24 }
  0x72   : > { %v387_v28 = vmul.f32 %v385_v25, %v385_v25 }
  0x75   : > { %v603_v27 = vpop.eup %602 }
  0x76   : > { %v605_v29 = vpop.eup %604  ;;  %v381_v30 = vmul.f32 0.6931472, %v603_v27 }
  0x77   : > { %v383_v31 = vmul.f32 0.6931472, %v605_v29 }
  0x78   : > { %v388_v32 = vmul.f32 %v386_v26, %v381_v30 }
  0x79   : > { %v389_v33 = vmul.f32 %v387_v28, %v383_v31 }
  0x7a   : > { %v392_v34 = vsel %vm391_vm11, %v388_v32, 0.0 }
  0x7b   : > { %v393_v36 = vsel %vm391_vm11, %v389_v33, 0.0 }
  0x7c   : > { %v394_v37 = vadd.f32 %v393_v36, %v392_v34 }
  0x7e   : > { %395 = vadd.xlane.f32.xlu0 %v394_v37 }
  0xf1   : > { %v396_v38 = vpop.xlane.xlu0 %395 }
  0xf2   : > { %v397_v39 = vrot.slane %v396_v38, 4 }
  0xf4   : > { %v398_v40 = vadd.f32 %v397_v39, %v396_v38 }
  0xf6   : > { %v399_v41 = vrot.slane %v398_v40, 2 }
  0xf8   : > { %v400_v42 = vadd.f32 %v399_v41, %v398_v40 }
  0xfa   : > { %v401_v43 = vrot.slane %v400_v42, 1 }
  0xfc   : > { %v402_v44 = vadd.f32 %v401_v43, %v400_v42 }
  0xfe   : > { %533 = vpush %v402_v44 }
 0x12f   : > { %s534_s3 = spop %533 }
 0x130   : > { %v404_v46 = vstv %s534_s3 }
 0x131   : > { %v405_v47 = vadd.f32 %v404_v46, %v390_v45 }
 0x133   : > { %407 = vst.msk [vmem:[%s259_s30] sm:$0x1] %vm264_vm12, %v405_v47 }
 0x134 PF: > { %s18_s14 = sadd.s32 1, %s720_s14   ;;  %s862_s9 = smov %s704_s10 }
 0x135   : > { %p15_p0 = scmp.ge.s32.totalorder %s18_s14, 4   ;;  %s863_s10 = smov %s708_s11 }
 0x136   : > { %s864_s11 = smov %s787_s21  ;;  %s865_s12 = smov %s716_s13 }
 0x137   : > { %s866_s13 = smov %s868_s16  ;;  %17 = sbr.rel (!%p15_p0) target bundleno = 6 (0x6), region = 85 }
 0x13c   :  { %431 = vsyncpa [#allocation3], 1 }
 0x13d   :  { %433 = vsyncpa [#allocation3 + $0x1], 1 }
 0x13e   :  { %434 = vsyncpa [#allocation5], 1 }
 0x13f   :  { %436 = vsyncpa [#allocation5 + $0x1], 1 }

</bundles_post_ra>
